<compile_context>
chip_gen: v5e
topology: v5e:2x2
jax: 0.10.0
libtpu: 0.0.40
codegen_flags: <defaults>
</compile_context>

<pallas_src>
import jax
import jax.numpy as jnp
from jax.experimental import pallas as pl
from jax.experimental.pallas import tpu as pltpu

N_NODES = 32          # input feature size (n_nodes); small synthetic choice
H1 = 512              # fixed by module
H2 = 512              # fixed by module
OUT = 100             # fixed by module
OUT_PAD = 128         # lane-dense padded output width (sliced back to 100)
SUBLANE = 16          # bf16 sublane packing -> batch rows padded to mult of 16
VMEM_LIMIT_BYTES = 32 * 1024 * 1024


def _round_up(n, m):
    return ((n + m - 1) // m) * m


def _mlp_kernel(x_ref, w1_ref, b1_ref, w2_ref, b2_ref, w3_ref, b3_ref, o_ref):
    """Whole MLP hot path on VMEM tiles: 3 bf16 MXU matmuls with f32
    accumulation; bias add + ReLU in f32 on the VPU (v5e-safe)."""
    x = x_ref[...]                                                  # bf16 (TM, 32)
    h = jnp.dot(x, w1_ref[...], preferred_element_type=jnp.float32)
    h = jnp.maximum(h + b1_ref[...], 0.0)                           # f32
    h = jnp.dot(h.astype(jnp.bfloat16), w2_ref[...],
                preferred_element_type=jnp.float32)
    h = jnp.maximum(h + b2_ref[...], 0.0)                           # f32
    h = jnp.dot(h.astype(jnp.bfloat16), w3_ref[...],
                preferred_element_type=jnp.float32)
    o_ref[...] = jnp.maximum(h + b3_ref[...], 0.0).astype(o_ref.dtype)


def prepare_params(params):
    """ONE-TIME param prep (hoisted out of the per-call forward):
       * zero-pad w3/b3 from 100 to 128 output lanes (padded columns stay
         exactly 0 after ReLU and are sliced off in the wrapper),
       * cast weights to bf16 for the MXU; biases stay f32 (they add into the
         f32 accumulator)."""
    w1, b1, w2, b2, w3, b3 = params
    w3p = jnp.pad(w3, ((0, 0), (0, OUT_PAD - OUT)))
    b3p = jnp.pad(b3, ((0, 0), (0, OUT_PAD - OUT)))
    return (w1.astype(jnp.bfloat16), b1.astype(jnp.float32),
            w2.astype(jnp.bfloat16), b2.astype(jnp.float32),
            w3p.astype(jnp.bfloat16), b3p.astype(jnp.float32))


def _choose_tiling(M):
    """Pick (TM, M_pad) for the stacked batch of M rows (bf16 -> mult of 16).
       * M_pad <= 512 : single tile (tiny batches are weight-DMA bound anyway)
       * M_pad <= 4096: two balanced tiles -> both v7x TensorCores get work
       * larger       : TM=2048 tiles to amortize per-step pipeline overhead,
                        weights stay VMEM-resident across steps."""
    m = _round_up(max(M, SUBLANE), SUBLANE)
    if m <= 512:
        return m, m
    if m <= 4096:
        tm = _round_up((m + 1) // 2, SUBLANE)
        return tm, 2 * tm
    tm = 2048
    return tm, _round_up(m, tm)


def embedding_forward_stacked(x, prepared_params):
    """Run the 3-layer MLP on a stacked batch of shape (M, N_NODES)."""
    w1, b1, w2, b2, w3p, b3p = prepared_params
    M = x.shape[0]
    TM, M_pad = _choose_tiling(M)

    x = x.astype(jnp.bfloat16)
    if M_pad != M:
        x = jnp.pad(x, ((0, M_pad - M), (0, 0)))     # zero rows, discarded later

    grid = (M_pad // TM,)
    # Constant (0, 0) index_map -> the weight/bias tiles are DMA'd once and
    # stay resident in VMEM across all batch-grid steps.
    w_spec = lambda shape: pl.BlockSpec(shape, lambda i: (0, 0))

    out = pl.pallas_call(
        _mlp_kernel,
        out_shape=jax.ShapeDtypeStruct((M_pad, OUT_PAD), jnp.float32),
        grid_spec=pltpu.PrefetchScalarGridSpec(
            num_scalar_prefetch=0,
            grid=grid,
            in_specs=[
                pl.BlockSpec((TM, N_NODES), lambda i: (i, 0)),   # batch-tiled x
                w_spec((N_NODES, H1)), w_spec((1, H1)),
                w_spec((H1, H2)),      w_spec((1, H2)),
                w_spec((H2, OUT_PAD)), w_spec((1, OUT_PAD)),
            ],
            out_specs=pl.BlockSpec((TM, OUT_PAD), lambda i: (i, 0)),
        ),
        compiler_params=pltpu.CompilerParams(
            # Batch axis is independent across grid steps -> "parallel" lets
            # v7x shard the (>=2 for mid batches) steps across its 2 TCs.
            dimension_semantics=("parallel",),
            # Explicit scoped-VMEM limit so TM up to 2048 compiles on v5e
            # (16 MiB default) while staying well under v7x's 64 MiB physical.
            vmem_limit_bytes=VMEM_LIMIT_BYTES),
    )(x, w1, b1, w2, b2, w3p, b3p)

    return out[:M, :OUT]


def embedding_network_forward(x1, x2, prepared_params):
    """Siamese forward: shared weights, ONE fused pallas_call for both inputs."""
    B1 = x1.shape[0]
    x = jnp.concatenate([x1, x2], axis=0)               # (B1 + B2, N_NODES)
    out = embedding_forward_stacked(x, prepared_params)  # single kernel launch
    return out[:B1], out[B1:]


def init_params(key):
    """Deterministic synthetic f32 weights (shapes match the nn.Linear layers,
    stored transposed as (in, out) so the kernel computes y = x @ W + b)."""
    k1, k2, k3, k4, k5, k6 = jax.random.split(key, 6)
    s1 = 1.0 / jnp.sqrt(N_NODES)
    s2 = 1.0 / jnp.sqrt(H1)
    s3 = 1.0 / jnp.sqrt(H2)
    w1 = jax.random.uniform(k1, (N_NODES, H1), jnp.float32, -s1, s1)
    b1 = jax.random.uniform(k2, (1, H1), jnp.float32, -s1, s1)
    w2 = jax.random.uniform(k3, (H1, H2), jnp.float32, -s2, s2)
    b2 = jax.random.uniform(k4, (1, H2), jnp.float32, -s2, s2)
    w3 = jax.random.uniform(k5, (H2, OUT), jnp.float32, -s3, s3)
    b3 = jax.random.uniform(k6, (1, OUT), jnp.float32, -s3, s3)
    return (w1, b1, w2, b2, w3, b3)


def _reference_forward_one(x, params):
    """Plain-JAX f32 reference of the same math (original-module semantics)."""
    w1, b1, w2, b2, w3, b3 = params
    h = jnp.maximum(x @ w1 + b1, 0.0)
    h = jnp.maximum(h @ w2 + b2, 0.0)
    return jnp.maximum(h @ w3 + b3, 0.0)


if __name__ == "__main__":
    key = jax.random.PRNGKey(0)
    kp, kx1, kx2, ky1, ky2 = jax.random.split(key, 5)

    params = init_params(kp)
    prepared = prepare_params(params)   # one-time prep (pad + bf16 cast)

    fwd = jax.jit(embedding_network_forward)

    # --- small-batch case (single-tile path) ---
    B = 2
    x1 = jax.random.normal(kx1, (B, N_NODES), jnp.float32)
    x2 = jax.random.normal(kx2, (B, N_NODES), jnp.float32)
    out1, out2 = fwd(x1, x2, prepared)
    out1 = jax.block_until_ready(out1)
    out2 = jax.block_until_ready(out2)

    ref1 = _reference_forward_one(x1, params)
    ref2 = _reference_forward_one(x2, params)
    assert out1.shape == (B, OUT) and out2.shape == (B, OUT)
    # bf16 operands (f32 accumulation) vs f32 reference -> relaxed tolerance.
    assert jnp.allclose(out1, ref1, atol=2e-2, rtol=2e-2)
    assert jnp.allclose(out2, ref2, atol=2e-2, rtol=2e-2)

    # --- mid-batch case (exercises the 2-step grid / v7x split path) ---
    Bm = 300
    y1 = jax.random.normal(ky1, (Bm, N_NODES), jnp.float32)
    y2 = jax.random.normal(ky2, (Bm, N_NODES), jnp.float32)
    om1, om2 = fwd(y1, y2, prepared)
    om1 = jax.block_until_ready(om1)
    om2 = jax.block_until_ready(om2)
    assert om1.shape == (Bm, OUT) and om2.shape == (Bm, OUT)
    assert jnp.allclose(om1, _reference_forward_one(y1, params), atol=2e-2, rtol=2e-2)
    assert jnp.allclose(om2, _reference_forward_one(y2, params), atol=2e-2, rtol=2e-2)

    print("KERNEL_OK")
</pallas_src>

<mosaic_0001>
module attributes {stable_mosaic.version = 11 : i64} {
  func.func @_mlp_kernel(%arg0: i32, %arg1: memref<16x32xbf16, #tpu.memory_space<vmem>>, %arg2: memref<32x512xbf16, #tpu.memory_space<vmem>>, %arg3: memref<1x512xf32, #tpu.memory_space<vmem>>, %arg4: memref<512x512xbf16, #tpu.memory_space<vmem>>, %arg5: memref<1x512xf32, #tpu.memory_space<vmem>>, %arg6: memref<512x128xbf16, #tpu.memory_space<vmem>>, %arg7: memref<1x128xf32, #tpu.memory_space<vmem>>, %arg8: memref<16x128xf32, #tpu.memory_space<vmem>>) attributes {dimension_semantics = [#tpu.dimension_semantics<parallel>], iteration_bounds = array<i64: 1>, scalar_prefetch = 0 : i64, scratch_operands = 0 : i64, tpu.core_type = #tpu.core_type<tc>, window_params = [{transform_indices = @transform_0, window_bounds = array<i64: 16, 32>}, {pipeline_mode = #tpu.pipeline_mode<synchronous>, transform_indices = @transform_1, window_bounds = array<i64: 32, 512>}, {pipeline_mode = #tpu.pipeline_mode<synchronous>, transform_indices = @transform_2, window_bounds = array<i64: 1, 512>}, {pipeline_mode = #tpu.pipeline_mode<synchronous>, transform_indices = @transform_3, window_bounds = array<i64: 512, 512>}, {pipeline_mode = #tpu.pipeline_mode<synchronous>, transform_indices = @transform_4, window_bounds = array<i64: 1, 512>}, {pipeline_mode = #tpu.pipeline_mode<synchronous>, transform_indices = @transform_5, window_bounds = array<i64: 512, 128>}, {pipeline_mode = #tpu.pipeline_mode<synchronous>, transform_indices = @transform_6, window_bounds = array<i64: 1, 128>}, {transform_indices = @transform_7, window_bounds = array<i64: 16, 128>}]} {
    %c0 = arith.constant 0 : index
    %c0_0 = arith.constant 0 : index
    %0 = vector.load %arg1[%c0, %c0_0] : memref<16x32xbf16, #tpu.memory_space<vmem>>, vector<16x32xbf16>
    %c0_1 = arith.constant 0 : index
    %c0_2 = arith.constant 0 : index
    %1 = vector.load %arg2[%c0_1, %c0_2] : memref<32x512xbf16, #tpu.memory_space<vmem>>, vector<32x512xbf16>
    %cst = arith.constant dense<0.000000e+00> : vector<16x512xf32>
    %2 = tpu.matmul %0, %1, %cst {dimension_numbers = #tpu.dot_dimension_numbers<[1], [0], [0], [1], [0, 0, 1, 1], [], []>} : vector<16x32xbf16>, vector<32x512xbf16>, vector<16x512xf32> -> vector<16x512xf32>
    %c0_3 = arith.constant 0 : index
    %c0_4 = arith.constant 0 : index
    %3 = vector.load %arg3[%c0_3, %c0_4] : memref<1x512xf32, #tpu.memory_space<vmem>>, vector<1x512xf32>
    %4 = vector.broadcast %3 : vector<1x512xf32> to vector<16x512xf32>
    %5 = arith.addf %2, %4 : vector<16x512xf32>
    %cst_5 = arith.constant 0.000000e+00 : f32
    %6 = vector.broadcast %cst_5 : f32 to vector<16x512xf32>
    %7 = arith.maximumf %5, %6 : vector<16x512xf32>
    %8 = arith.truncf %7 : vector<16x512xf32> to vector<16x512xbf16>
    %c0_6 = arith.constant 0 : index
    %c0_7 = arith.constant 0 : index
    %9 = vector.load %arg4[%c0_6, %c0_7] : memref<512x512xbf16, #tpu.memory_space<vmem>>, vector<512x512xbf16>
    %cst_8 = arith.constant dense<0.000000e+00> : vector<16x512xf32>
    %10 = tpu.matmul %8, %9, %cst_8 {dimension_numbers = #tpu.dot_dimension_numbers<[1], [0], [0], [1], [0, 0, 1, 1], [], []>} : vector<16x512xbf16>, vector<512x512xbf16>, vector<16x512xf32> -> vector<16x512xf32>
    %c0_9 = arith.constant 0 : index
    %c0_10 = arith.constant 0 : index
    %11 = vector.load %arg5[%c0_9, %c0_10] : memref<1x512xf32, #tpu.memory_space<vmem>>, vector<1x512xf32>
    %12 = vector.broadcast %11 : vector<1x512xf32> to vector<16x512xf32>
    %13 = arith.addf %10, %12 : vector<16x512xf32>
    %cst_11 = arith.constant 0.000000e+00 : f32
    %14 = vector.broadcast %cst_11 : f32 to vector<16x512xf32>
    %15 = arith.maximumf %13, %14 : vector<16x512xf32>
    %16 = arith.truncf %15 : vector<16x512xf32> to vector<16x512xbf16>
    %c0_12 = arith.constant 0 : index
    %c0_13 = arith.constant 0 : index
    %17 = vector.load %arg6[%c0_12, %c0_13] : memref<512x128xbf16, #tpu.memory_space<vmem>>, vector<512x128xbf16>
    %cst_14 = arith.constant dense<0.000000e+00> : vector<16x128xf32>
    %18 = tpu.matmul %16, %17, %cst_14 {dimension_numbers = #tpu.dot_dimension_numbers<[1], [0], [0], [1], [0, 0, 1, 1], [], []>} : vector<16x512xbf16>, vector<512x128xbf16>, vector<16x128xf32> -> vector<16x128xf32>
    %c0_15 = arith.constant 0 : index
    %c0_16 = arith.constant 0 : index
    %19 = vector.load %arg7[%c0_15, %c0_16] : memref<1x128xf32, #tpu.memory_space<vmem>>, vector<1x128xf32>
    %20 = vector.broadcast %19 : vector<1x128xf32> to vector<16x128xf32>
    %21 = arith.addf %18, %20 : vector<16x128xf32>
    %cst_17 = arith.constant 0.000000e+00 : f32
    %22 = vector.broadcast %cst_17 : f32 to vector<16x128xf32>
    %23 = arith.maximumf %21, %22 : vector<16x128xf32>
    %c0_18 = arith.constant 0 : index
    %c0_19 = arith.constant 0 : index
    %24 = vector.load %arg8[%c0_18, %c0_19] : memref<16x128xf32, #tpu.memory_space<vmem>>, vector<16x128xf32>
    tpu.vector_store %arg8[%c0_18, %c0_19], %23 {strides = array<i32>} : memref<16x128xf32, #tpu.memory_space<vmem>>, vector<16x128xf32>,
    return
  }
  func.func @transform_0(%arg0: i32) -> (i32, i32) {
    %c0_i32 = arith.constant 0 : i32
    %c0_i32_0 = arith.constant 0 : i32
    return %arg0, %c0_i32 : i32, i32
  }
  func.func @transform_1(%arg0: i32) -> (i32, i32) {
    %c0_i32 = arith.constant 0 : i32
    %c0_i32_0 = arith.constant 0 : i32
    %c0_i32_1 = arith.constant 0 : i32
    return %c0_i32, %c0_i32_0 : i32, i32
  }
  func.func @transform_2(%arg0: i32) -> (i32, i32) {
    %c0_i32 = arith.constant 0 : i32
    %c0_i32_0 = arith.constant 0 : i32
    %c0_i32_1 = arith.constant 0 : i32
    return %c0_i32, %c0_i32_0 : i32, i32
  }
  func.func @transform_3(%arg0: i32) -> (i32, i32) {
    %c0_i32 = arith.constant 0 : i32
    %c0_i32_0 = arith.constant 0 : i32
    %c0_i32_1 = arith.constant 0 : i32
    return %c0_i32, %c0_i32_0 : i32, i32
  }
  func.func @transform_4(%arg0: i32) -> (i32, i32) {
    %c0_i32 = arith.constant 0 : i32
    %c0_i32_0 = arith.constant 0 : i32
    %c0_i32_1 = arith.constant 0 : i32
    return %c0_i32, %c0_i32_0 : i32, i32
  }
  func.func @transform_5(%arg0: i32) -> (i32, i32) {
    %c0_i32 = arith.constant 0 : i32
    %c0_i32_0 = arith.constant 0 : i32
    %c0_i32_1 = arith.constant 0 : i32
    return %c0_i32, %c0_i32_0 : i32, i32
  }
  func.func @transform_6(%arg0: i32) -> (i32, i32) {
    %c0_i32 = arith.constant 0 : i32
    %c0_i32_0 = arith.constant 0 : i32
    %c0_i32_1 = arith.constant 0 : i32
    return %c0_i32, %c0_i32_0 : i32, i32
  }
  func.func @transform_7(%arg0: i32) -> (i32, i32) {
    %c0_i32 = arith.constant 0 : i32
    %c0_i32_0 = arith.constant 0 : i32
    return %arg0, %c0_i32 : i32, i32
  }
}

</mosaic_0001>

<bundles_post_ra>
// kernel: embedding_network_forward.1
= control target key start
LH: loop header
LB: loop body
LE: loop exit
PB: predicated region body
PF: predicated region fallthrough
CT: control target
= control target key end

     0   :  { %12 = vsyncpa [#allocation3], 0  ;;  %s2592_s0 = inlined_call_operand.vmem [shape: bf16[16,32], index: 0, kind: input, shape index: {}]   ;;  %s2593_s1 = inlined_call_operand.hbm [shape: bf16[32,512], index: 1, kind: input, shape index: {}]   ;;  %s2594_s2 = inlined_call_operand.vmem [shape: f32[1,512], index: 2, kind: input, shape index: {}]   ;;  %s2595_s3 = inlined_call_operand.hbm [shape: bf16[512,512], index: 3, kind: input, shape index: {}]   ;;  %s2596_s4 = inlined_call_operand.vmem [shape: f32[1,512], index: 4, kind: input, shape index: {}]   ;;  %s2597_s5 = inlined_call_operand.hbm [shape: bf16[512,128], index: 5, kind: input, shape index: {}]   ;;  %s2598_s6 = inlined_call_operand.vmem [shape: f32[1,128], index: 6, kind: input, shape index: {}]   ;;  %s2599_s7 = inlined_call_operand.vmem [shape: f32[16,128], index: 7, kind: output, shape index: {}]  }
   0x1   :  { %13 = vsyncpa [#allocation5], 0  ;;  %s35_s26 = sshll.u32 %s2595_s3, 4  ;;  %s2484_s27 = smov [#allocation4]   ;;  %s36_s26 = int_to_ptr.hbm [resolvable:$true] %s35_s26 }
   0x2   :  { %s37_s28 = sshll.u32 %s2484_s27, 4  ;;  %s20_s8 = sshll.u32 %s2593_s1, 4  ;;  %s38_s28 = int_to_ptr.vmem [resolvable:$true] %s37_s28  ;;  %s21_s8 = int_to_ptr.hbm [resolvable:$true] %s20_s8 }
   0x3   :  { %s2485_s9 = smov 256   ;;  %s2486_s10 = smov 16  }
   0x4   :  { %43 = dma.hbm_to_vmem [thread:$0]  %s36_s26, 16384, %s38_s28, [#allocation5], %s2485_s9, %s2485_s9, %s2486_s10  }
   0x5   :  { %s2487_s11 = smov [#allocation2]   ;;  %s50_s15 = sshll.u32 %s2597_s5, 4  ;;  %s51_s15 = int_to_ptr.hbm [resolvable:$true] %s50_s15 }
   0x6   :  { %s22_s12 = sshll.u32 %s2487_s11, 4  ;;  %s2488_s3 = smov [#allocation6]   ;;  %s23_s12 = int_to_ptr.vmem [resolvable:$true] %s22_s12 }
   0x7   :  { %28 = dma.hbm_to_vmem [thread:$0]  %s21_s8, 1024, %s23_s12, [#allocation3], %s2485_s9, %s2485_s9, %s2486_s10  }
   0x8   :  { %s52_s16 = sshll.u32 %s2488_s3, 4  ;;  %s2489_s17 = smov 64   ;;  %s53_s16 = int_to_ptr.vmem [resolvable:$true] %s52_s16 }
   0x9   :  { %s2490_s18 = smov 4  }
   0xa   :  { %58 = dma.hbm_to_vmem [thread:$0]  %s51_s15, 4096, %s53_s16, [#allocation5], %s2489_s17, %s2489_s17, %s2490_s18  }
   0xb   :  { %2480 = dma.done.wait [#allocation3], 1024  }
   0xc   :  { %2481 = vsyncadd [#allocation3], 4294966272 }
   0xd   :  { %2482 = dma.done.wait [#allocation5], 20480  }
   0xe   :  { %2483 = vsyncadd [#allocation5], 4294946816  ;;  %v1573_v0 = vld [vmem:[#allocation2 + $0x20] sm:$0xf]  ;;  %v2238_v1 = vld [vmem:[#allocation2 + $0x2c] sm:$0xf0] }
   0xf   :  { %v2236_v2 = vld [vmem:[#allocation2 + $0x24] sm:$0xf]  ;;  %v1574_v3 = vor.u32 %v2238_v1, %v1573_v0  ;;  %v1575_v4 = vld [vmem:[#allocation2 + $0x30] sm:$0xf0]  ;;  %v1581_v5 = vld [vmem:[#allocation2 + $0x28] sm:$0xf] }
  0x10   :  { %v2239_v6 = vld [vmem:[#allocation2 + $0x34] sm:$0xf0]  ;;  %v1578_v7 = vor.u32 %v2236_v2, %v1575_v4  ;;  %v2237_v9 = vld [vmem:[#allocation2 + $0x2c] sm:$0xf]  ;;  %v1583_v10 = vld [vmem:[#allocation2 + $0x38] sm:$0xf0] }
  0x11   :  { %v1582_v8 = vor.u32 %v2239_v6, %v1581_v5  ;;  %v1557_v11 = vld [vmem:[#allocation2] sm:$0xf]  ;;  %149 = vmatpush.bf16.msra.mxu0 %v1574_v3  ;;  %v1586_v12 = vor.u32 %v2237_v9, %v1583_v10  ;;  %v2234_v13 = vld [vmem:[#allocation2 + $0xc] sm:$0xf0]  ;;  %v2232_v14 = vld [vmem:[#allocation2 + $0x4] sm:$0xf] }
  0x12   :  { %v1559_v15 = vld [vmem:[#allocation2 + $0x10] sm:$0xf0]  ;;  %163 = vmatpush.bf16.msra.mxu1 %v1578_v7  ;;  %v1558_v16 = vor.u32 %v2234_v13, %v1557_v11  ;;  %v1565_v18 = vld [vmem:[#allocation2 + $0x8] sm:$0xf]  ;;  %v2235_v19 = vld [vmem:[#allocation2 + $0x14] sm:$0xf0] }
  0x13   :  { %177 = vmatpush.bf16.msra.mxu2 %v1582_v8  ;;  %v1562_v17 = vor.u32 %v2232_v14, %v1559_v15  ;;  %v2233_v20 = vld [vmem:[#allocation2 + $0xc] sm:$0xf]  ;;  %191 = vmatpush.bf16.msra.mxu3 %v1586_v12  ;;  %v1566_v21 = vor.u32 %v2235_v19, %v1565_v18  ;;  %v1567_v22 = vld [vmem:[#allocation2 + $0x18] sm:$0xf0]  ;;  %v2231_v23 = vld [vmem:[%s2592_s0] sm:$0xff]  ;;  %vm139_vm0 = vcmask 261120  }
  0x14   :  { %v1705_v24 = vld [vmem:[#allocation4 + $0xe0] sm:$0xf]  ;;  %v1570_v25 = vor.u32 %v2233_v20, %v1567_v22  ;;  %v2270_v26 = vld [vmem:[#allocation4 + $0xec] sm:$0xf0] }
  0x15   :  { %v1833_v27 = vld [vmem:[#allocation4 + $0x1e0] sm:$0xf]  ;;  %v2302_v28 = vld [vmem:[#allocation4 + $0x1ec] sm:$0xf0]  ;;  %150 = vmatpush.bf16.msra.mxu0 %v1558_v16  ;;  %v1706_v29 = vor.u32 %v2270_v26, %v1705_v24 }
  0x16   :  { %v1834_v30 = vor.u32 %v2302_v28, %v1833_v27  ;;  %v1689_v31 = vld [vmem:[#allocation4 + $0xc0] sm:$0xf]  ;;  %v2266_v32 = vld [vmem:[#allocation4 + $0xcc] sm:$0xf0]  ;;  %164 = vmatpush.bf16.msra.mxu1 %v1562_v17 }
  0x17   :  { %v1817_v33 = vld [vmem:[#allocation4 + $0x1c0] sm:$0xf]  ;;  %178 = vmatpush.bf16.msra.mxu2 %v1566_v21  ;;  %v2298_v34 = vld [vmem:[#allocation4 + $0x1cc] sm:$0xf0]  ;;  %192 = vmatpush.bf16.msra.mxu3 %v1570_v25  ;;  %v1690_v37 = vor.u32 %v2266_v32, %v1689_v31 }
  0x18   :  { %v1961_v35 = vld [vmem:[#allocation4 + $0x2e0] sm:$0xf]  ;;  %v2334_v36 = vld [vmem:[#allocation4 + $0x2ec] sm:$0xf0]  ;;  %1587 = vmatmul.msk.bf16.vlgmr.msra.gmra.mxu0 %vm139_vm0, %v2231_v23  ;;  %v1818_v42 = vor.u32 %v2298_v34, %v1817_v33 }
  0x19   :  { %989 = vmatpush.bf16.msrb.mxu0 %v1706_v29  ;;  %v1962_v38 = vor.u32 %v2334_v36, %v1961_v35  ;;  %v2089_v39 = vld [vmem:[#allocation4 + $0x3e0] sm:$0xf]  ;;  %v2366_v40 = vld [vmem:[#allocation4 + $0x3ec] sm:$0xf0]  ;;  %1588 = vmatmul.msk.bf16.vlgmr.msra.gmra.mxu1 %vm139_vm0, %v2231_v23 }
  0x1a   :  { %v1673_v41 = vld [vmem:[#allocation4 + $0xa0] sm:$0xf]  ;;  %1003 = vmatpush.bf16.msrb.mxu1 %v1834_v30  ;;  %v2090_v43 = vor.u32 %v2366_v40, %v2089_v39  ;;  %v2262_v44 = vld [vmem:[#allocation4 + $0xac] sm:$0xf0]  ;;  %1589 = vmatmul.msk.bf16.vlgmr.msra.gmra.mxu2 %vm139_vm0, %v2231_v23 }
  0x1b   :  { %v1801_v45 = vld [vmem:[#allocation4 + $0x1a0] sm:$0xf]  ;;  %v2294_v46 = vld [vmem:[#allocation4 + $0x1ac] sm:$0xf0]  ;;  %1590 = vmatmul.msk.bf16.vlgmr.msra.gmra.mxu3 %vm139_vm0, %v2231_v23  ;;  %1017 = vmatpush.bf16.msrb.mxu2 %v1962_v38  ;;  %v1674_v52 = vor.u32 %v2262_v44, %v1673_v41 }
  0x1c   :  { %v1945_v47 = vld [vmem:[#allocation4 + $0x2c0] sm:$0xf]  ;;  %v2330_v48 = vld [vmem:[#allocation4 + $0x2cc] sm:$0xf0]  ;;  %1031 = vmatpush.bf16.msrb.mxu3 %v2090_v43  ;;  %v1802_v57 = vor.u32 %v2294_v46, %v1801_v45 }
  0x1d   :  { %v2073_v49 = vld [vmem:[#allocation4 + $0x3c0] sm:$0xf]  ;;  %v1946_v50 = vor.u32 %v2330_v48, %v1945_v47  ;;  %v2362_v51 = vld [vmem:[#allocation4 + $0x3cc] sm:$0xf0]  ;;  %990 = vmatpush.bf16.msrb.mxu0 %v1690_v37  ;;  %v2268_v47 = vld [vmem:[#allocation4 + $0xe4] sm:$0xf] }
  0x1e   :  { %v2074_v53 = vor.u32 %v2362_v51, %v2073_v49  ;;  %v1657_v54 = vld [vmem:[#allocation4 + $0x80] sm:$0xf]  ;;  %v2258_v55 = vld [vmem:[#allocation4 + $0x8c] sm:$0xf0]  ;;  %1004 = vmatpush.bf16.msrb.mxu1 %v1818_v42  ;;  %v1707_v48 = vld [vmem:[#allocation4 + $0xf0] sm:$0xf0] }
  0x1f   :  { %v1929_v56 = vld [vmem:[#allocation4 + $0x2a0] sm:$0xf]  ;;  %v2326_v58 = vld [vmem:[#allocation4 + $0x2ac] sm:$0xf0]  ;;  %1018 = vmatpush.bf16.msrb.mxu2 %v1946_v50  ;;  %v1658_v0 = vor.u32 %v2258_v55, %v1657_v54  ;;  %v2300_v49 = vld [vmem:[#allocation4 + $0x1e4] sm:$0xf] }
  0x20   :  { %v2057_v59 = vld [vmem:[#allocation4 + $0x3a0] sm:$0xf]  ;;  %v2358_v60 = vld [vmem:[#allocation4 + $0x3ac] sm:$0xf0]  ;;  %v1930_v63 = vor.u32 %v2326_v58, %v1929_v56  ;;  %1032 = vmatpush.bf16.msrb.mxu3 %v2074_v53  ;;  %v1835_v50 = vld [vmem:[#allocation4 + $0x1f0] sm:$0xf0] }
  0x21   :  { %v1785_v61 = vld [vmem:[#allocation4 + $0x180] sm:$0xf]  ;;  %v2290_v62 = vld [vmem:[#allocation4 + $0x18c] sm:$0xf0]  ;;  %991 = vmatpush.bf16.msrb.mxu0 %v1674_v52  ;;  %v2058_v1 = vor.u32 %v2358_v60, %v2057_v59  ;;  %v2264_v54 = vld [vmem:[#allocation4 + $0xc4] sm:$0xf]  ;;  %v1710_v60 = vor.u32 %v2268_v47, %v1707_v48 }
  0x22   :  { %v1641_v2 = vld [vmem:[#allocation4 + $0x60] sm:$0xf]  ;;  %v2322_v4 = vld [vmem:[#allocation4 + $0x28c] sm:$0xf0]  ;;  %1005 = vmatpush.bf16.msrb.mxu1 %v1802_v57  ;;  %v1786_v5 = vor.u32 %v2290_v62, %v1785_v61  ;;  %v1691_v55 = vld [vmem:[#allocation4 + $0xd0] sm:$0xf0] }
  0x23   :  { %v1913_v3 = vld [vmem:[#allocation4 + $0x280] sm:$0xf]  ;;  %v2254_v6 = vld [vmem:[#allocation4 + $0x6c] sm:$0xf0]  ;;  %1019 = vmatpush.bf16.msrb.mxu2 %v1930_v63  ;;  %v2332_v62 = vld [vmem:[#allocation4 + $0x2e4] sm:$0xf] }
  0x24   :  { %v2041_v7 = vld [vmem:[#allocation4 + $0x380] sm:$0xf]  ;;  %v2354_v8 = vld [vmem:[#allocation4 + $0x38c] sm:$0xf0]  ;;  %v1914_v11 = vor.u32 %v2322_v4, %v1913_v3  ;;  %1033 = vmatpush.bf16.msrb.mxu3 %v2058_v1  ;;  %v1642_v12 = vor.u32 %v2254_v6, %v1641_v2  ;;  %v1963_v63 = vld [vmem:[#allocation4 + $0x2f0] sm:$0xf0] }
  0x25   :  { %v1769_v9 = vld [vmem:[#allocation4 + $0x160] sm:$0xf]  ;;  %v2286_v10 = vld [vmem:[#allocation4 + $0x16c] sm:$0xf0]  ;;  %992 = vmatpush.bf16.msrb.mxu0 %v1658_v0  ;;  %v2042_v13 = vor.u32 %v2354_v8, %v2041_v7  ;;  %v1838_v0 = vor.u32 %v2300_v49, %v1835_v50  ;;  %v2364_v1 = vld [vmem:[#allocation4 + $0x3e4] sm:$0xf]  ;;  %v1966_v7 = vor.u32 %v2332_v62, %v1963_v63  ;;  %v1694_v8 = vor.u32 %v2264_v54, %v1691_v55 }
  0x26   :  { %v1625_v14 = vld [vmem:[#allocation4 + $0x40] sm:$0xf]  ;;  %v2318_v16 = vld [vmem:[#allocation4 + $0x26c] sm:$0xf0]  ;;  %1006 = vmatpush.bf16.msrb.mxu1 %v1786_v5  ;;  %v1770_v17 = vor.u32 %v2286_v10, %v1769_v9  ;;  %v2091_v2 = vld [vmem:[#allocation4 + $0x3f0] sm:$0xf0] }
  0x27   :  { %v1897_v15 = vld [vmem:[#allocation4 + $0x260] sm:$0xf]  ;;  %v2250_v18 = vld [vmem:[#allocation4 + $0x4c] sm:$0xf0]  ;;  %1020 = vmatpush.bf16.msrb.mxu2 %v1914_v11  ;;  %v2296_v3 = vld [vmem:[#allocation4 + $0x1c4] sm:$0xf]  ;;  %v2094_v9 = vor.u32 %v2364_v1, %v2091_v2 }
  0x28   :  { %v2025_v19 = vld [vmem:[#allocation4 + $0x360] sm:$0xf]  ;;  %v2350_v20 = vld [vmem:[#allocation4 + $0x36c] sm:$0xf0]  ;;  %v1898_v23 = vor.u32 %v2318_v16, %v1897_v15  ;;  %1034 = vmatpush.bf16.msrb.mxu3 %v2042_v13  ;;  %v1626_v24 = vor.u32 %v2250_v18, %v1625_v14  ;;  %v1819_v4 = vld [vmem:[#allocation4 + $0x1d0] sm:$0xf0] }
  0x29   :  { %v1753_v21 = vld [vmem:[#allocation4 + $0x140] sm:$0xf]  ;;  %v2282_v22 = vld [vmem:[#allocation4 + $0x14c] sm:$0xf0]  ;;  %993 = vmatpush.bf16.msrb.mxu0 %v1642_v12  ;;  %v2026_v25 = vor.u32 %v2350_v20, %v2025_v19  ;;  %v2260_v10 = vld [vmem:[#allocation4 + $0xa4] sm:$0xf]  ;;  %v1822_v13 = vor.u32 %v2296_v3, %v1819_v4 }
  0x2a   :  { %v1609_v26 = vld [vmem:[#allocation4 + $0x20] sm:$0xf]  ;;  %v2314_v28 = vld [vmem:[#allocation4 + $0x24c] sm:$0xf0]  ;;  %1007 = vmatpush.bf16.msrb.mxu1 %v1770_v17  ;;  %v1754_v29 = vor.u32 %v2282_v22, %v1753_v21  ;;  %v2328_v11 = vld [vmem:[#allocation4 + $0x2c4] sm:$0xf] }
  0x2b   :  { %v1881_v27 = vld [vmem:[#allocation4 + $0x240] sm:$0xf]  ;;  %v2246_v30 = vld [vmem:[#allocation4 + $0x2c] sm:$0xf0]  ;;  %1021 = vmatpush.bf16.msrb.mxu2 %v1898_v23  ;;  %v1947_v12 = vld [vmem:[#allocation4 + $0x2d0] sm:$0xf0] }
  0x2c   :  { %v2009_v31 = vld [vmem:[#allocation4 + $0x340] sm:$0xf]  ;;  %v2346_v32 = vld [vmem:[#allocation4 + $0x34c] sm:$0xf0]  ;;  %v1882_v35 = vor.u32 %v2314_v28, %v1881_v27  ;;  %1035 = vmatpush.bf16.msrb.mxu3 %v2026_v25  ;;  %v1610_v37 = vor.u32 %v2246_v30, %v1609_v26  ;;  %v1675_v14 = vld [vmem:[#allocation4 + $0xb0] sm:$0xf0]  ;;  %v1950_v19 = vor.u32 %v2328_v11, %v1947_v12 }
  0x2d   :  { %v1737_v33 = vld [vmem:[#allocation4 + $0x120] sm:$0xf]  ;;  %v2278_v34 = vld [vmem:[#allocation4 + $0x12c] sm:$0xf0]  ;;  %994 = vmatpush.bf16.msrb.mxu0 %v1626_v24  ;;  %v2010_v38 = vor.u32 %v2346_v32, %v2009_v31  ;;  %v2360_v15 = vld [vmem:[#allocation4 + $0x3c4] sm:$0xf]  ;;  %v1678_v20 = vor.u32 %v2260_v10, %v1675_v14 }
  0x2e   :  { %v1593_v36 = vld [vmem:[#allocation4] sm:$0xf]  ;;  %v2242_v39 = vld [vmem:[#allocation4 + $0xc] sm:$0xf0]  ;;  %1008 = vmatpush.bf16.msrb.mxu1 %v1754_v29  ;;  %v1738_v42 = vor.u32 %v2278_v34, %v1737_v33  ;;  %v2075_v16 = vld [vmem:[#allocation4 + $0x3d0] sm:$0xf0] }
  0x2f   :  { %v1865_v40 = vld [vmem:[#allocation4 + $0x220] sm:$0xf]  ;;  %v2310_v41 = vld [vmem:[#allocation4 + $0x22c] sm:$0xf0]  ;;  %1022 = vmatpush.bf16.msrb.mxu2 %v1882_v35  ;;  %v1594_v52 = vor.u32 %v2242_v39, %v1593_v36  ;;  %v2292_v17 = vld [vmem:[#allocation4 + $0x1a4] sm:$0xf]  ;;  %v2078_v21 = vor.u32 %v2360_v15, %v2075_v16 }
  0x30   :  { %v1721_v43 = vld [vmem:[#allocation4 + $0x100] sm:$0xf]  ;;  %v2342_v45 = vld [vmem:[#allocation4 + $0x32c] sm:$0xf0]  ;;  %v1866_v51 = vor.u32 %v2310_v41, %v1865_v40  ;;  %1036 = vmatpush.bf16.msrb.mxu3 %v2010_v38  ;;  %v1803_v18 = vld [vmem:[#allocation4 + $0x1b0] sm:$0xf0] }
  0x31   :  { %v1993_v44 = vld [vmem:[#allocation4 + $0x320] sm:$0xf]  ;;  %v2274_v46 = vld [vmem:[#allocation4 + $0x10c] sm:$0xf0]  ;;  %995 = vmatpush.bf16.msrb.mxu0 %v1610_v37  ;;  %v1806_v22 = vor.u32 %v2292_v17, %v1803_v18  ;;  %v2256_v23 = vld [vmem:[#allocation4 + $0x84] sm:$0xf] }
  0x32   :  { %v1994_v53 = vor.u32 %v2342_v45, %v1993_v44  ;;  %v1849_v56 = vld [vmem:[#allocation4 + $0x200] sm:$0xf]  ;;  %v2306_v57 = vld [vmem:[#allocation4 + $0x20c] sm:$0xf0]  ;;  %1009 = vmatpush.bf16.msrb.mxu1 %v1738_v42  ;;  %v1722_v59 = vor.u32 %v2274_v46, %v1721_v43  ;;  %v1659_v24 = vld [vmem:[#allocation4 + $0x90] sm:$0xf0] }
  0x33   :  { %v1977_v58 = vld [vmem:[#allocation4 + $0x300] sm:$0xf]  ;;  %v2338_v61 = vld [vmem:[#allocation4 + $0x30c] sm:$0xf0]  ;;  %1023 = vmatpush.bf16.msrb.mxu2 %v1866_v51  ;;  %v1850_v5 = vor.u32 %v2306_v57, %v1849_v56  ;;  %v2288_v25 = vld [vmem:[#allocation4 + $0x184] sm:$0xf]  ;;  %v1662_v27 = vor.u32 %v2256_v23, %v1659_v24 }
  0x34   :  { %1037 = vmatpush.bf16.msrb.mxu3 %v1994_v53  ;;  %v1978_v6 = vor.u32 %v2338_v61, %v1977_v58  ;;  %v1787_v26 = vld [vmem:[#allocation4 + $0x190] sm:$0xf0]  ;;  %v2324_v29 = vld [vmem:[#allocation4 + $0x2a4] sm:$0xf] }
  0x35   :  { %996 = vmatpush.bf16.msrb.mxu0 %v1594_v52  ;;  %v1790_v28 = vor.u32 %v2288_v25, %v1787_v26  ;;  %v1931_v30 = vld [vmem:[#allocation4 + $0x2b0] sm:$0xf0]  ;;  %v2356_v31 = vld [vmem:[#allocation4 + $0x3a4] sm:$0xf]  ;;  %v84_v25 = vld [vmem:[%s2594_s2] sm:$0xf] }
  0x36   :  { %1010 = vmatpush.bf16.msrb.mxu1 %v1722_v59  ;;  %v1934_v32 = vor.u32 %v2324_v29, %v1931_v30  ;;  %v2059_v33 = vld [vmem:[#allocation4 + $0x3b0] sm:$0xf0]  ;;  %v2252_v35 = vld [vmem:[#allocation4 + $0x64] sm:$0xf]  ;;  %v87_v29 = vperm.slane %v84_v25, 1 }
  0x37   :  { %1024 = vmatpush.bf16.msrb.mxu2 %v1850_v5  ;;  %v2062_v34 = vor.u32 %v2356_v31, %v2059_v33  ;;  %v1643_v36 = vld [vmem:[#allocation4 + $0x70] sm:$0xf0]  ;;  %v2284_v37 = vld [vmem:[#allocation4 + $0x164] sm:$0xf] }
  0x38   :  { %1038 = vmatpush.bf16.msrb.mxu3 %v1978_v6  ;;  %v1646_v38 = vor.u32 %v2252_v35, %v1643_v36  ;;  %v1771_v39 = vld [vmem:[#allocation4 + $0x170] sm:$0xf0]  ;;  %v2320_v41 = vld [vmem:[#allocation4 + $0x284] sm:$0xf] }
  0x39   :  { %1045 = vmatpush.bf16.msra.mxu0 %v1710_v60  ;;  %v1774_v40 = vor.u32 %v2284_v37, %v1771_v39  ;;  %v1915_v42 = vld [vmem:[#allocation4 + $0x290] sm:$0xf0]  ;;  %v2352_v44 = vld [vmem:[#allocation4 + $0x384] sm:$0xf]  ;;  %v2271_v39 = vld [vmem:[#allocation4 + $0xf4] sm:$0xf0] }
  0x3a   :  { %1059 = vmatpush.bf16.msra.mxu1 %v1838_v0  ;;  %v1918_v43 = vor.u32 %v2320_v41, %v1915_v42  ;;  %v2043_v45 = vld [vmem:[#allocation4 + $0x390] sm:$0xf0]  ;;  %v2248_v47 = vld [vmem:[#allocation4 + $0x44] sm:$0xf]  ;;  %v88_v41 = vperm.slane %v84_v25, 2 }
  0x3b   :  { %1073 = vmatpush.bf16.msra.mxu2 %v1966_v7  ;;  %v2046_v46 = vor.u32 %v2352_v44, %v2043_v45  ;;  %v1627_v48 = vld [vmem:[#allocation4 + $0x50] sm:$0xf0]  ;;  %v2280_v49 = vld [vmem:[#allocation4 + $0x144] sm:$0xf]  ;;  %v2303_v44 = vld [vmem:[#allocation4 + $0x1f4] sm:$0xf0] }
  0x3c   :  { %1087 = vmatpush.bf16.msra.mxu3 %v2094_v9  ;;  %v1630_v50 = vor.u32 %v2248_v47, %v1627_v48  ;;  %v1755_v51 = vld [vmem:[#allocation4 + $0x150] sm:$0xf0]  ;;  %v2316_v53 = vld [vmem:[#allocation4 + $0x264] sm:$0xf]  ;;  %v89_v45 = vperm.slane %v84_v25, 3 }
  0x3d   :  { %1046 = vmatpush.bf16.msra.mxu0 %v1694_v8  ;;  %v1758_v52 = vor.u32 %v2280_v49, %v1755_v51  ;;  %v1899_v54 = vld [vmem:[#allocation4 + $0x270] sm:$0xf0]  ;;  %v2348_v55 = vld [vmem:[#allocation4 + $0x364] sm:$0xf]  ;;  %v1697_v51 = vld [vmem:[#allocation4 + $0xc8] sm:$0xf] }
  0x3e   :  { %1060 = vmatpush.bf16.msra.mxu1 %v1822_v13  ;;  %v1902_v56 = vor.u32 %v2316_v53, %v1899_v54  ;;  %v2027_v57 = vld [vmem:[#allocation4 + $0x370] sm:$0xf0]  ;;  %v2244_v59 = vld [vmem:[#allocation4 + $0x24] sm:$0xf] }
  0x3f   :  { %1074 = vmatpush.bf16.msra.mxu2 %v1950_v19  ;;  %v2030_v58 = vor.u32 %v2348_v55, %v2027_v57  ;;  %v1611_v60 = vld [vmem:[#allocation4 + $0x30] sm:$0xf0]  ;;  %v2276_v62 = vld [vmem:[#allocation4 + $0x124] sm:$0xf]  ;;  %v1825_v55 = vld [vmem:[#allocation4 + $0x1c8] sm:$0xf] }
  0x40   :  { %1088 = vmatpush.bf16.msra.mxu3 %v2078_v21  ;;  %v1614_v61 = vor.u32 %v2244_v59, %v1611_v60  ;;  %v1739_v63 = vld [vmem:[#allocation4 + $0x130] sm:$0xf0]  ;;  %v2312_v1 = vld [vmem:[#allocation4 + $0x244] sm:$0xf] }
  0x41   :  { %1047 = vmatpush.bf16.msra.mxu0 %v1678_v20  ;;  %v1742_v0 = vor.u32 %v2276_v62, %v1739_v63  ;;  %v1883_v2 = vld [vmem:[#allocation4 + $0x250] sm:$0xf0]  ;;  %v2344_v3 = vld [vmem:[#allocation4 + $0x344] sm:$0xf]  ;;  %v1969_v62 = vld [vmem:[#allocation4 + $0x2e8] sm:$0xf] }
  0x42   :  { %1061 = vmatpush.bf16.msra.mxu1 %v1806_v22  ;;  %v1886_v4 = vor.u32 %v2312_v1, %v1883_v2  ;;  %v2011_v5 = vld [vmem:[#allocation4 + $0x350] sm:$0xf0]  ;;  %v2240_v7 = vld [vmem:[#allocation4 + $0x4] sm:$0xf]  ;;  %v2335_v63 = vld [vmem:[#allocation4 + $0x2f4] sm:$0xf0] }
  0x43   :  { %1075 = vmatpush.bf16.msra.mxu2 %v1934_v32  ;;  %v2014_v6 = vor.u32 %v2344_v3, %v2011_v5  ;;  %v1595_v8 = vld [vmem:[#allocation4 + $0x10] sm:$0xf0]  ;;  %v2272_v9 = vld [vmem:[#allocation4 + $0x104] sm:$0xf]  ;;  %v2367_v3 = vld [vmem:[#allocation4 + $0x3f4] sm:$0xf0] }
  0x44   :  { %1089 = vmatpush.bf16.msra.mxu3 %v2062_v34  ;;  %v1598_v10 = vor.u32 %v2240_v7, %v1595_v8  ;;  %v1723_v11 = vld [vmem:[#allocation4 + $0x110] sm:$0xf0]  ;;  %v2308_v13 = vld [vmem:[#allocation4 + $0x224] sm:$0xf]  ;;  %v2263_v5 = vld [vmem:[#allocation4 + $0xb4] sm:$0xf0] }
  0x45   :  { %1048 = vmatpush.bf16.msra.mxu0 %v1662_v27  ;;  %v1726_v12 = vor.u32 %v2272_v9, %v1723_v11  ;;  %v1867_v14 = vld [vmem:[#allocation4 + $0x230] sm:$0xf0]  ;;  %v2340_v15 = vld [vmem:[#allocation4 + $0x324] sm:$0xf]  ;;  %v86_v27 = vperm.slane %v84_v25, 0 }
  0x46   :  { %1062 = vmatpush.bf16.msra.mxu1 %v1790_v28  ;;  %v1995_v16 = vld [vmem:[#allocation4 + $0x330] sm:$0xf0]  ;;  %v1870_v17 = vor.u32 %v2308_v13, %v1867_v14  ;;  %v2304_v19 = vld [vmem:[#allocation4 + $0x204] sm:$0xf]  ;;  %v1809_v8 = vld [vmem:[#allocation4 + $0x1a8] sm:$0xf] }
  0x47   :  { %1076 = vmatpush.bf16.msra.mxu2 %v1918_v43  ;;  %v1998_v18 = vor.u32 %v2340_v15, %v1995_v16  ;;  %v1851_v20 = vld [vmem:[#allocation4 + $0x210] sm:$0xf0]  ;;  %v2336_v22 = vld [vmem:[#allocation4 + $0x304] sm:$0xf]  ;;  %v1841_v43 = vld [vmem:[#allocation4 + $0x1e8] sm:$0xf] }
  0x48   :  { %1090 = vmatpush.bf16.msra.mxu3 %v2046_v46  ;;  %v1854_v21 = vor.u32 %v2304_v19, %v1851_v20  ;;  %v1979_v23 = vld [vmem:[#allocation4 + $0x310] sm:$0xf0]  ;;  %v2295_v9 = vld [vmem:[#allocation4 + $0x1b4] sm:$0xf0]  ;;  %v1953_v16 = vld [vmem:[#allocation4 + $0x2c8] sm:$0xf] }
  0x49   :  { %1049 = vmatpush.bf16.msra.mxu0 %v1646_v38  ;;  %v1982_v24 = vor.u32 %v2336_v22, %v1979_v23  ;;  %v1713_v38 = vld [vmem:[#allocation4 + $0xe8] sm:$0xf]  ;;  %v1810_v20 = vor.u32 %v2295_v9, %v1809_v8  ;;  %v2259_v23 = vld [vmem:[#allocation4 + $0x94] sm:$0xf0] }
  0x4a   :  { %1063 = vmatpush.bf16.msra.mxu1 %v1774_v40  ;;  %v1714_v48 = vor.u32 %v2271_v39, %v1713_v38  ;;  %v1665_v22 = vld [vmem:[#allocation4 + $0x88] sm:$0xf]  ;;  %v2291_v25 = vld [vmem:[#allocation4 + $0x194] sm:$0xf0] }
  0x4b   :  { %1077 = vmatpush.bf16.msra.mxu2 %v1902_v56  ;;  %v2299_v56 = vld [vmem:[#allocation4 + $0x1d4] sm:$0xf0]  ;;  %v1601_v8 = vld [vmem:[#allocation4 + $0x8] sm:$0xf] }
  0x4c   :  { %1091 = vmatpush.bf16.msra.mxu3 %v2030_v58  ;;  %v1826_v2 = vor.u32 %v2299_v56, %v1825_v55  ;;  %v2319_v55 = vld [vmem:[#allocation4 + $0x274] sm:$0xf0] }
  0x4d   :  { %1050 = vmatpush.bf16.msra.mxu0 %v1630_v50  ;;  %v1842_v50 = vor.u32 %v2303_v44, %v1841_v43  ;;  %v2049_v44 = vld [vmem:[#allocation4 + $0x388] sm:$0xf]  ;;  %v2243_v9 = vld [vmem:[#allocation4 + $0x14] sm:$0xf0] }
  0x4e   :  { %1064 = vmatpush.bf16.msra.mxu1 %v1758_v52  ;;  %v2267_v52 = vld [vmem:[#allocation4 + $0xd4] sm:$0xf0] }
  0x4f   :  { %1078 = vmatpush.bf16.msra.mxu2 %v1886_v4  ;;  %v1681_v4 = vld [vmem:[#allocation4 + $0xa8] sm:$0xf] }
  0x50   :  { %1092 = vmatpush.bf16.msra.mxu3 %v2014_v6  ;;  %v1682_v15 = vor.u32 %v2263_v5, %v1681_v4  ;;  %v2017_v4 = vld [vmem:[#allocation4 + $0x348] sm:$0xf] }
  0x51   :  { %1051 = vmatpush.bf16.msra.mxu0 %v1614_v61  ;;  %v1698_v61 = vor.u32 %v2267_v52, %v1697_v51 }
  0x52   :  { %1065 = vmatpush.bf16.msra.mxu1 %v1742_v0  ;;  %v2097_v0 = vld [vmem:[#allocation4 + $0x3e8] sm:$0xf] }
  0x53   :  { %1079 = vmatpush.bf16.msra.mxu2 %v1870_v17  ;;  %v2098_v14 = vor.u32 %v2367_v3, %v2097_v0  ;;  %v2331_v17 = vld [vmem:[#allocation4 + $0x2d4] sm:$0xf0] }
  0x54   :  { %1093 = vmatpush.bf16.msra.mxu3 %v1998_v18  ;;  %v2081_v18 = vld [vmem:[#allocation4 + $0x3c8] sm:$0xf]  ;;  %v2315_v3 = vld [vmem:[#allocation4 + $0x254] sm:$0xf0] }
  0x55   :  { %1052 = vmatpush.bf16.msra.mxu0 %v1598_v10 }
  0x56   :  { %1066 = vmatpush.bf16.msra.mxu1 %v1726_v12  ;;  %v1970_v12 = vor.u32 %v2335_v63, %v1969_v62  ;;  %v1745_v62 = vld [vmem:[#allocation4 + $0x128] sm:$0xf]  ;;  %v2279_v63 = vld [vmem:[#allocation4 + $0x134] sm:$0xf0] }
  0x57   :  { %1080 = vmatpush.bf16.msra.mxu2 %v1854_v21  ;;  %v2363_v21 = vld [vmem:[#allocation4 + $0x3d4] sm:$0xf0] }
  0x58   :  { %1094 = vmatpush.bf16.msra.mxu3 %v1982_v24  ;;  %v1793_v24 = vld [vmem:[#allocation4 + $0x188] sm:$0xf] }
  0x95   :  { %v152_v26 = vpop.f32.mrf.mxu0 }
  0x96   :  { %v166_v28 = vpop.f32.mrf.mxu1  ;;  %v153_v30 = vadd.f32 %v152_v26, %v86_v27  ;;  %v1954_v26 = vor.u32 %v2331_v17, %v1953_v16  ;;  %v2301_v16 = vld [vmem:[#allocation4 + $0x1ec] sm:$0xf]  ;;  %v1843_v17 = vld [vmem:[#allocation4 + $0x1f8] sm:$0xf0] }
  0x97   :  { %v167_v31 = vadd.f32 %v166_v28, %v87_v29  ;;  %v1666_v28 = vor.u32 %v2259_v23, %v1665_v22  ;;  %v1602_v22 = vor.u32 %v2243_v9, %v1601_v8  ;;  %v2253_v8 = vld [vmem:[#allocation4 + $0x6c] sm:$0xf]  ;;  %v1651_v9 = vld [vmem:[#allocation4 + $0x78] sm:$0xf0] }
  0x98   :  { %v199_v35 = vmax.f32 %v153_v30, 0.0  ;;  %v2327_v30 = vld [vmem:[#allocation4 + $0x2b4] sm:$0xf0] }
  0x99   :  { %v200_v40 = vmax.f32 %v167_v31, 0.0  ;;  %v1794_v31 = vor.u32 %v2291_v25, %v1793_v24  ;;  %v2001_v24 = vld [vmem:[#allocation4 + $0x328] sm:$0xf]  ;;  %v2343_v25 = vld [vmem:[#allocation4 + $0x334] sm:$0xf0] }
  0x9d   :  { %v180_v32 = vpop.f32.mrf.mxu2  ;;  %v154_v34 = vpop.f32.mrf.mxu0 }
  0x9e   :  { %v194_v33 = vpop.f32.mrf.mxu3  ;;  %v155_v36 = vadd.f32 %v154_v34, %v86_v27  ;;  %v168_v37 = vpop.f32.mrf.mxu1  ;;  %v181_v53 = vadd.f32 %v180_v32, %v88_v41  ;;  %v2082_v27 = vor.u32 %v2363_v21, %v2081_v18  ;;  %v2065_v32 = vld [vmem:[#allocation4 + $0x3a8] sm:$0xf]  ;;  %v2311_v21 = vld [vmem:[#allocation4 + $0x234] sm:$0xf0] }
  0x9f   :  { %v169_v42 = vadd.f32 %v168_v37, %v87_v29  ;;  %v195_v57 = vadd.f32 %v194_v33, %v89_v45  ;;  %v1937_v29 = vld [vmem:[#allocation4 + $0x2a8] sm:$0xf]  ;;  %v2359_v33 = vld [vmem:[#allocation4 + $0x3b4] sm:$0xf0] }
  0xa0   :  { %v203_v46 = vmax.f32 %v155_v36, 0.0  ;;  %v201_v6 = vmax.f32 %v181_v53, 0.0  ;;  %v1649_v34 = vld [vmem:[#allocation4 + $0x68] sm:$0xf]  ;;  %v2287_v37 = vld [vmem:[#allocation4 + $0x174] sm:$0xf0]  ;;  %v1938_v38 = vor.u32 %v2327_v30, %v1937_v29  ;;  %v2066_v39 = vor.u32 %v2359_v33, %v2065_v32 }
  0xa1   :  { %v204_v47 = vmax.f32 %v169_v42, 0.0  ;;  %v202_v10 = vmax.f32 %v195_v57, 0.0  ;;  %v1777_v36 = vld [vmem:[#allocation4 + $0x168] sm:$0xf]  ;;  %v1699_v30 = vld [vmem:[#allocation4 + $0xd8] sm:$0xf0]  ;;  %v2002_v33 = vor.u32 %v2343_v25, %v2001_v24 }
  0xa2   :  { %v2550_v49 = vpack.c.bf16 %v203_v46, %v199_v35  ;;  %v2255_v35 = vld [vmem:[#allocation4 + $0x74] sm:$0xf0]  ;;  %v1778_v43 = vor.u32 %v2287_v37, %v1777_v36  ;;  %v1633_v46 = vld [vmem:[#allocation4 + $0x48] sm:$0xf]  ;;  %v1827_v32 = vld [vmem:[#allocation4 + $0x1d8] sm:$0xf0] }
  0xa3   :  { %v2552_v54 = vpack.c.bf16 %v204_v47, %v200_v40  ;;  %v1921_v40 = vld [vmem:[#allocation4 + $0x288] sm:$0xf]  ;;  %v1650_v42 = vor.u32 %v2255_v35, %v1649_v34  ;;  %v2251_v47 = vld [vmem:[#allocation4 + $0x54] sm:$0xf0]  ;;  %v2281_v24 = vld [vmem:[#allocation4 + $0x14c] sm:$0xf] }
  0xa4   :  { %997 = vmatmul.bf16.vlgmr.msrb.gmra.mxu0 %v2550_v49  ;;  %v1905_v53 = vld [vmem:[#allocation4 + $0x268] sm:$0xf]  ;;  %v1634_v56 = vor.u32 %v2251_v47, %v1633_v46  ;;  %v2307_v35 = vld [vmem:[#allocation4 + $0x214] sm:$0xf0]  ;;  %v1683_v46 = vld [vmem:[#allocation4 + $0xb8] sm:$0xf0] }
  0xa5   :  { %v182_v58 = vpop.f32.mrf.mxu2  ;;  %1011 = vmatmul.bf16.vlgmr.msrb.gmra.mxu1 %v2552_v54  ;;  %1101 = vmatpush.bf16.msrb.mxu0 %v1714_v48  ;;  %v1761_v48 = vld [vmem:[#allocation4 + $0x148] sm:$0xf]  ;;  %v1906_v0 = vor.u32 %v2319_v55, %v1905_v53  ;;  %v2339_v37 = vld [vmem:[#allocation4 + $0x314] sm:$0xf0]  ;;  %v2293_v47 = vld [vmem:[#allocation4 + $0x1ac] sm:$0xf] }
  0xa6   :  { %v183_v59 = vadd.f32 %v182_v58, %v88_v41  ;;  %v196_v60 = vpop.f32.mrf.mxu3  ;;  %1115 = vmatpush.bf16.msrb.mxu1 %v1842_v50  ;;  %v2323_v41 = vld [vmem:[#allocation4 + $0x294] sm:$0xf0]  ;;  %v2033_v58 = vld [vmem:[#allocation4 + $0x368] sm:$0xf]  ;;  %v2329_v53 = vld [vmem:[#allocation4 + $0x2cc] sm:$0xf] }
  0xa7   :  { %v197_v1 = vadd.f32 %v196_v60, %v89_v45  ;;  %v2355_v45 = vld [vmem:[#allocation4 + $0x394] sm:$0xf0]  ;;  %v1922_v51 = vor.u32 %v2323_v41, %v1921_v40  ;;  %v1617_v60 = vld [vmem:[#allocation4 + $0x28] sm:$0xf]  ;;  %v1955_v55 = vld [vmem:[#allocation4 + $0x2d8] sm:$0xf0] }
  0xa8   :  { %v205_v7 = vmax.f32 %v183_v59, 0.0  ;;  %v2283_v50 = vld [vmem:[#allocation4 + $0x154] sm:$0xf0]  ;;  %v2050_v52 = vor.u32 %v2355_v45, %v2049_v44  ;;  %v1857_v34 = vld [vmem:[#allocation4 + $0x208] sm:$0xf] }
  0xa9   :  { %v206_v11 = vmax.f32 %v197_v1, 0.0  ;;  %1102 = vmatpush.bf16.msrb.mxu0 %v1698_v61  ;;  %v1762_v57 = vor.u32 %v2283_v50, %v1761_v48  ;;  %v2351_v59 = vld [vmem:[#allocation4 + $0x374] sm:$0xf0]  ;;  %v1985_v36 = vld [vmem:[#allocation4 + $0x308] sm:$0xf]  ;;  %v1858_v45 = vor.u32 %v2307_v35, %v1857_v34 }
  0xaa   :  { %v2556_v13 = vpack.c.bf16 %v205_v7, %v201_v6  ;;  %1116 = vmatpush.bf16.msrb.mxu1 %v1826_v2  ;;  %v2247_v61 = vld [vmem:[#allocation4 + $0x34] sm:$0xf0]  ;;  %v2034_v1 = vor.u32 %v2351_v59, %v2033_v58  ;;  %v1889_v2 = vld [vmem:[#allocation4 + $0x248] sm:$0xf]  ;;  %v1746_v6 = vor.u32 %v2279_v63, %v1745_v62  ;;  %v2261_v44 = vld [vmem:[#allocation4 + $0xac] sm:$0xf]  ;;  %v1986_v50 = vor.u32 %v2339_v37, %v1985_v36 }
  0xab   :  { %v2558_v19 = vpack.c.bf16 %v206_v11, %v202_v10  ;;  %v1618_v5 = vor.u32 %v2247_v61, %v1617_v60  ;;  %v2347_v7 = vld [vmem:[#allocation4 + $0x354] sm:$0xf0]  ;;  %v1729_v10 = vld [vmem:[#allocation4 + $0x108] sm:$0xf]  ;;  %v1811_v48 = vld [vmem:[#allocation4 + $0x1b8] sm:$0xf0] }
  0xac   :  { %1025 = vmatmul.bf16.vlgmr.msrb.gmra.mxu2 %v2556_v13  ;;  %v2275_v11 = vld [vmem:[#allocation4 + $0x114] sm:$0xf0]  ;;  %v2018_v18 = vor.u32 %v2347_v7, %v2017_v4  ;;  %v2361_v58 = vld [vmem:[#allocation4 + $0x3cc] sm:$0xf]  ;;  %v2083_v59 = vld [vmem:[#allocation4 + $0x3d8] sm:$0xf0] }
  0xad   :  { %1039 = vmatmul.bf16.vlgmr.msrb.gmra.mxu3 %v2558_v19  ;;  %1129 = vmatpush.bf16.msrb.mxu2 %v1970_v12  ;;  %v2269_v12 = vld [vmem:[#allocation4 + $0xec] sm:$0xf]  ;;  %v1730_v23 = vor.u32 %v2275_v11, %v1729_v10  ;;  %v1667_v61 = vld [vmem:[#allocation4 + $0x98] sm:$0xf0] }
  0xae   :  { %1143 = vmatpush.bf16.msrb.mxu3 %v2098_v14  ;;  %1103 = vmatpush.bf16.msrb.mxu0 %v1682_v15  ;;  %v1890_v14 = vor.u32 %v2315_v3, %v1889_v2  ;;  %v1715_v15 = vld [vmem:[#allocation4 + $0xf8] sm:$0xf0]  ;;  %v2257_v60 = vld [vmem:[#allocation4 + $0x8c] sm:$0xf] }
  0xaf   :  { %1117 = vmatpush.bf16.msrb.mxu1 %v1810_v20  ;;  %v1873_v20 = vld [vmem:[#allocation4 + $0x228] sm:$0xf]  ;;  %v2289_v62 = vld [vmem:[#allocation4 + $0x18c] sm:$0xf]  ;;  %v1795_v63 = vld [vmem:[#allocation4 + $0x198] sm:$0xf0]  ;;  %v1670_v4 = vor.u32 %v2257_v60, %v1667_v61 }
  0xb0   :  { %v1874_v29 = vor.u32 %v2311_v21, %v1873_v20  ;;  %v2325_v2 = vld [vmem:[#allocation4 + $0x2ac] sm:$0xf]  ;;  %v1939_v3 = vld [vmem:[#allocation4 + $0x2b8] sm:$0xf0] }
  0xb1   :  { %1130 = vmatpush.bf16.msrb.mxu2 %v1954_v26  ;;  %v1718_v26 = vor.u32 %v2269_v12, %v1715_v15  ;;  %v2067_v7 = vld [vmem:[#allocation4 + $0x3b8] sm:$0xf0]  ;;  %v2285_v10 = vld [vmem:[#allocation4 + $0x16c] sm:$0xf]  ;;  %v1942_v12 = vor.u32 %v2325_v2, %v1939_v3 }
  0xb2   :  { %1144 = vmatpush.bf16.msrb.mxu3 %v2082_v27  ;;  %1104 = vmatpush.bf16.msrb.mxu0 %v1666_v28  ;;  %v1846_v27 = vor.u32 %v2301_v16, %v1843_v17  ;;  %v2265_v28 = vld [vmem:[#allocation4 + $0xcc] sm:$0xf]  ;;  %v1779_v11 = vld [vmem:[#allocation4 + $0x178] sm:$0xf0]  ;;  %v1654_v17 = vor.u32 %v2253_v8, %v1651_v9 }
  0xb3   :  { %1118 = vmatpush.bf16.msrb.mxu1 %v1794_v31  ;;  %v2297_v31 = vld [vmem:[#allocation4 + $0x1cc] sm:$0xf]  ;;  %v1702_v40 = vor.u32 %v2265_v28, %v1699_v30  ;;  %v1923_v16 = vld [vmem:[#allocation4 + $0x298] sm:$0xf0] }
  0xb4   :  { %1053 = vmatmul.bf16.vlgmr.msra.gmra.mxu0 %v2550_v49  ;;  %v1830_v41 = vor.u32 %v2297_v31, %v1827_v32  ;;  %v2321_v15 = vld [vmem:[#allocation4 + $0x28c] sm:$0xf]  ;;  %v2051_v21 = vld [vmem:[#allocation4 + $0x398] sm:$0xf0] }
  0xb5   :  { %1131 = vmatpush.bf16.msrb.mxu2 %v1938_v38  ;;  %1067 = vmatmul.bf16.vlgmr.msra.gmra.mxu1 %v2552_v54  ;;  %v2333_v38 = vld [vmem:[#allocation4 + $0x2ec] sm:$0xf]  ;;  %v1763_v25 = vld [vmem:[#allocation4 + $0x158] sm:$0xf0] }
  0xb6   :  { %1145 = vmatpush.bf16.msrb.mxu3 %v2066_v39  ;;  %1105 = vmatpush.bf16.msrb.mxu0 %v1650_v42  ;;  %v1971_v39 = vld [vmem:[#allocation4 + $0x2f8] sm:$0xf0]  ;;  %v2365_v42 = vld [vmem:[#allocation4 + $0x3ec] sm:$0xf]  ;;  %v1766_v31 = vor.u32 %v2281_v24, %v1763_v25  ;;  %v2376_v25 = vld [vmem:[#allocation6 + $0x40] sm:$0xff] }
  0xb7   :  { %1119 = vmatpush.bf16.msrb.mxu1 %v1778_v43  ;;  %v2099_v43 = vld [vmem:[#allocation4 + $0x3f8] sm:$0xf0]  ;;  %v2353_v20 = vld [vmem:[#allocation4 + $0x38c] sm:$0xf] }
  0xb8   :  { %v2317_v28 = vld [vmem:[#allocation4 + $0x26c] sm:$0xf]  ;;  %v1619_v35 = vld [vmem:[#allocation4 + $0x38] sm:$0xf0] }
  0xb9   :  { %1132 = vmatpush.bf16.msrb.mxu2 %v1922_v51  ;;  %v1974_v51 = vor.u32 %v2333_v38, %v1971_v39  ;;  %v2349_v32 = vld [vmem:[#allocation4 + $0x36c] sm:$0xf]  ;;  %v1747_v37 = vld [vmem:[#allocation4 + $0x138] sm:$0xf0] }
  0xba   :  { %1146 = vmatpush.bf16.msrb.mxu3 %v2050_v52  ;;  %1106 = vmatpush.bf16.msrb.mxu0 %v1634_v56  ;;  %v2102_v52 = vor.u32 %v2365_v42, %v2099_v43  ;;  %v1686_v56 = vor.u32 %v2261_v44, %v1683_v46  ;;  %v2245_v34 = vld [vmem:[#allocation4 + $0x2c] sm:$0xf]  ;;  %v2375_v60 = vld [vmem:[#allocation6 + $0x38] sm:$0xff] }
  0xbb   :  { %1120 = vmatpush.bf16.msrb.mxu1 %v1762_v57  ;;  %v1814_v57 = vor.u32 %v2293_v47, %v1811_v48  ;;  %v2277_v36 = vld [vmem:[#allocation4 + $0x12c] sm:$0xf]  ;;  %v1622_v42 = vor.u32 %v2245_v34, %v1619_v35  ;;  %v1603_v47 = vld [vmem:[#allocation4 + $0x18] sm:$0xf0] }
  0xbc   :  { %1081 = vmatmul.bf16.vlgmr.msra.gmra.mxu2 %v2556_v13  ;;  %v1750_v43 = vor.u32 %v2277_v36, %v1747_v37  ;;  %v2345_v44 = vld [vmem:[#allocation4 + $0x34c] sm:$0xf]  ;;  %v1987_v2 = vld [vmem:[#allocation4 + $0x318] sm:$0xf0]  ;;  %v2386_v36 = vld [vmem:[#allocation6 + $0x90] sm:$0xff] }
  0xbd   :  { %1095 = vmatmul.bf16.vlgmr.msra.gmra.mxu3 %v2558_v19  ;;  %1133 = vmatpush.bf16.msrb.mxu2 %v1906_v0  ;;  %v1958_v0 = vor.u32 %v2329_v53, %v1955_v55  ;;  %v2241_v46 = vld [vmem:[#allocation4 + $0xc] sm:$0xf]  ;;  %v1875_v55 = vld [vmem:[#allocation4 + $0x238] sm:$0xf0] }
  0xbe   :  { %1147 = vmatpush.bf16.msrb.mxu3 %v2034_v1  ;;  %1107 = vmatpush.bf16.msrb.mxu0 %v1618_v5  ;;  %v2086_v1 = vor.u32 %v2361_v58, %v2083_v59  ;;  %v1798_v5 = vor.u32 %v2289_v62, %v1795_v63  ;;  %v2273_v48 = vld [vmem:[#allocation4 + $0x10c] sm:$0xf]  ;;  %v2003_v59 = vld [vmem:[#allocation4 + $0x338] sm:$0xf0] }
  0xbf   :  { %1121 = vmatpush.bf16.msrb.mxu1 %v1746_v6  ;;  %v2357_v6 = vld [vmem:[#allocation4 + $0x3ac] sm:$0xf]  ;;  %v2371_v8 = vld [vmem:[#allocation6 + $0x18] sm:$0xff] }
  0xc0   :  { %v2309_v53 = vld [vmem:[#allocation4 + $0x22c] sm:$0xf]  ;;  %v2383_v9 = vld [vmem:[#allocation6 + $0x78] sm:$0xff] }
  0xc1   :  { %1134 = vmatpush.bf16.msrb.mxu2 %v1890_v14  ;;  %v2070_v14 = vor.u32 %v2357_v6, %v2067_v7  ;;  %v2341_v58 = vld [vmem:[#allocation4 + $0x32c] sm:$0xf]  ;;  %v1878_v61 = vor.u32 %v2309_v53, %v1875_v55  ;;  %v2372_v7 = vld [vmem:[#allocation6 + $0x20] sm:$0xff] }
  0xc2   :  { %1148 = vmatpush.bf16.msrb.mxu3 %v2018_v18  ;;  %1108 = vmatpush.bf16.msrb.mxu0 %v1602_v22  ;;  %v1782_v18 = vor.u32 %v2285_v10, %v1779_v11  ;;  %v2249_v22 = vld [vmem:[#allocation4 + $0x4c] sm:$0xf]  ;;  %v2006_v62 = vor.u32 %v2341_v58, %v2003_v59  ;;  %v2382_v10 = vld [vmem:[#allocation6 + $0x70] sm:$0xff] }
  0xc3   :  { %1122 = vmatpush.bf16.msrb.mxu1 %v1730_v23  ;;  %v1635_v23 = vld [vmem:[#allocation4 + $0x58] sm:$0xf0]  ;;  %v2305_v63 = vld [vmem:[#allocation4 + $0x20c] sm:$0xf] }
  0xc4   :  { %v1638_v30 = vor.u32 %v2249_v22, %v1635_v23  ;;  %v2373_v6 = vld [vmem:[#allocation6 + $0x28] sm:$0xff] }
  0xc5   :  { %1135 = vmatpush.bf16.msrb.mxu2 %v1874_v29  ;;  %1109 = vmatmul.bf16.vlgmr.msrb.gmra.mxu0 %v2550_v49  ;;  %v1907_v29 = vld [vmem:[#allocation4 + $0x278] sm:$0xf0]  ;;  %v2381_v11 = vld [vmem:[#allocation6 + $0x68] sm:$0xff] }
  0xc6   :  { %1157 = vmatpush.bf16.msra.mxu0 %v1718_v26  ;;  %1149 = vmatpush.bf16.msrb.mxu3 %v2002_v33  ;;  %v1926_v26 = vor.u32 %v2321_v15, %v1923_v16  ;;  %v2035_v33 = vld [vmem:[#allocation4 + $0x378] sm:$0xf0]  ;;  %v1910_v38 = vor.u32 %v2317_v28, %v1907_v29  ;;  %v2389_v22 = vld [vmem:[#allocation6 + $0xa8] sm:$0xff] }
  0xc7   :  { %1171 = vmatpush.bf16.msra.mxu1 %v1846_v27  ;;  %v2054_v27 = vor.u32 %v2353_v20, %v2051_v21  ;;  %v2038_v39 = vor.u32 %v2349_v32, %v2035_v33  ;;  %v2577_v20 = vld [vmem:[%s2596_s4] sm:$0xf]  ;;  %v2377_v21 = vld [vmem:[#allocation6 + $0x48] sm:$0xff] }
  0xc8   :  { %1123 = vmatmul.bf16.vlgmr.msrb.gmra.mxu1 %v2552_v54  ;;  %v341_v23 = vperm.slane %v2577_v20, 0 }
  0xc9   :  { %1136 = vmatpush.bf16.msrb.mxu2 %v1858_v45  ;;  %v2019_v45 = vld [vmem:[#allocation4 + $0x358] sm:$0xf0] }
  0xca   :  { %1158 = vmatpush.bf16.msra.mxu0 %v1702_v40  ;;  %1150 = vmatpush.bf16.msrb.mxu3 %v1986_v50  ;;  %v2313_v40 = vld [vmem:[#allocation4 + $0x24c] sm:$0xf]  ;;  %v1731_v50 = vld [vmem:[#allocation4 + $0x118] sm:$0xf0] }
  0xcb   :  { %1172 = vmatpush.bf16.msra.mxu1 %v1830_v41  ;;  %v1891_v41 = vld [vmem:[#allocation4 + $0x258] sm:$0xf0] }
  0xcc   :  { %1137 = vmatmul.bf16.vlgmr.msrb.gmra.mxu2 %v2556_v13 }
  0xcd   :  { %1185 = vmatpush.bf16.msra.mxu2 %v1974_v51  ;;  %1151 = vmatmul.bf16.vlgmr.msrb.gmra.mxu3 %v2558_v19  ;;  %v1894_v51 = vor.u32 %v2313_v40, %v1891_v41 }
  0xce   :  { %1199 = vmatpush.bf16.msra.mxu3 %v2102_v52  ;;  %1159 = vmatpush.bf16.msra.mxu0 %v1686_v56  ;;  %v2022_v52 = vor.u32 %v2345_v44, %v2019_v45  ;;  %v1606_v56 = vor.u32 %v2241_v46, %v1603_v47  ;;  %v342_v44 = vperm.slane %v2577_v20, 1 }
  0xcf   :  { %1173 = vmatpush.bf16.msra.mxu1 %v1814_v57  ;;  %v1734_v57 = vor.u32 %v2273_v48, %v1731_v50  ;;  %v2384_v50 = vld [vmem:[#allocation6 + $0x80] sm:$0xff] }
  0xd1   :  { %1186 = vmatpush.bf16.msra.mxu2 %v1958_v0  ;;  %v1859_v0 = vld [vmem:[#allocation4 + $0x218] sm:$0xf0] }
  0xd2   :  { %1200 = vmatpush.bf16.msra.mxu3 %v2086_v1  ;;  %1160 = vmatpush.bf16.msra.mxu0 %v1670_v4  ;;  %v2337_v1 = vld [vmem:[#allocation4 + $0x30c] sm:$0xf]  ;;  %v1862_v3 = vor.u32 %v2305_v63, %v1859_v0 }
  0xd3   :  { %1174 = vmatpush.bf16.msra.mxu1 %v1798_v5  ;;  %v1990_v4 = vor.u32 %v2337_v1, %v1987_v2  ;;  %v2374_v5 = vld [vmem:[#allocation6 + $0x30] sm:$0xff] }
  0xd5   :  { %1187 = vmatpush.bf16.msra.mxu2 %v1942_v12  ;;  %v2379_v12 = vld [vmem:[#allocation6 + $0x58] sm:$0xff] }
  0xd6   :  { %1201 = vmatpush.bf16.msra.mxu3 %v2070_v14  ;;  %1161 = vmatpush.bf16.msra.mxu0 %v1654_v17  ;;  %v2391_v14 = vld [vmem:[#allocation6 + $0xb8] sm:$0xff]  ;;  %v2378_v17 = vld [vmem:[#allocation6 + $0x50] sm:$0xff] }
  0xd7   :  { %1175 = vmatpush.bf16.msra.mxu1 %v1782_v18  ;;  %v2390_v18 = vld [vmem:[#allocation6 + $0xb0] sm:$0xff] }
  0xd9   :  { %1188 = vmatpush.bf16.msra.mxu2 %v1926_v26  ;;  %v2388_v26 = vld [vmem:[#allocation6 + $0xa0] sm:$0xff] }
  0xda   :  { %1202 = vmatpush.bf16.msra.mxu3 %v2054_v27  ;;  %1162 = vmatpush.bf16.msra.mxu0 %v1638_v30 }
  0xdb   :  { %1176 = vmatpush.bf16.msra.mxu1 %v1766_v31  ;;  %v2387_v31 = vld [vmem:[#allocation6 + $0x98] sm:$0xff] }
  0xdd   :  { %1189 = vmatpush.bf16.msra.mxu2 %v1910_v38 }
  0xde   :  { %1203 = vmatpush.bf16.msra.mxu3 %v2038_v39  ;;  %1163 = vmatpush.bf16.msra.mxu0 %v1622_v42 }
  0xdf   :  { %1177 = vmatpush.bf16.msra.mxu1 %v1750_v43  ;;  %v2385_v43 = vld [vmem:[#allocation6 + $0x88] sm:$0xff] }
  0xe1   :  { %1190 = vmatpush.bf16.msra.mxu2 %v1894_v51  ;;  %v2399_v51 = vld [vmem:[#allocation6 + $0xf8] sm:$0xff] }
  0xe2   :  { %1204 = vmatpush.bf16.msra.mxu3 %v2022_v52  ;;  %1164 = vmatpush.bf16.msra.mxu0 %v1606_v56 }
  0xe3   :  { %1178 = vmatpush.bf16.msra.mxu1 %v1734_v57  ;;  %v2398_v57 = vld [vmem:[#allocation6 + $0xf0] sm:$0xff] }
  0xe5   :  { %1191 = vmatpush.bf16.msra.mxu2 %v1878_v61  ;;  %1165 = vmatmul.bf16.vlgmr.msra.gmra.mxu0 %v2550_v49  ;;  %v2370_v49 = vld [vmem:[#allocation6 + $0x10] sm:$0xff]  ;;  %v2397_v61 = vld [vmem:[#allocation6 + $0xe8] sm:$0xff] }
  0xe6   :  { %1485 = vmatpush.bf16.msrb.mxu0 %v2375_v60  ;;  %1205 = vmatpush.bf16.msra.mxu3 %v2006_v62 }
  0xe7   :  { %1179 = vmatmul.bf16.vlgmr.msra.gmra.mxu1 %v2552_v54  ;;  %v2369_v54 = vld [vmem:[#allocation6 + $0x8] sm:$0xff] }
  0xe8   :  { %1499 = vmatpush.bf16.msrb.mxu1 %v2383_v9 }
  0xe9   :  { %1192 = vmatpush.bf16.msra.mxu2 %v1862_v3 }
  0xea   :  { %1206 = vmatpush.bf16.msra.mxu3 %v1990_v4  ;;  %1486 = vmatpush.bf16.msrb.mxu0 %v2374_v5  ;;  %v2396_v5 = vld [vmem:[#allocation6 + $0xe0] sm:$0xff] }
  0xec   :  { %1193 = vmatmul.bf16.vlgmr.msra.gmra.mxu2 %v2556_v13  ;;  %1500 = vmatpush.bf16.msrb.mxu1 %v2382_v10  ;;  %v2368_v13 = vld [vmem:[#allocation6] sm:$0xff]  ;;  %v2395_v10 = vld [vmem:[#allocation6 + $0xd8] sm:$0xff] }
  0xed   :  { %1207 = vmatmul.bf16.vlgmr.msra.gmra.mxu3 %v2558_v19  ;;  %v2380_v19 = vld [vmem:[#allocation6 + $0x60] sm:$0xff]  ;;  %1513 = vmatpush.bf16.msrb.mxu2 %v2391_v14  ;;  %v2394_v14 = vld [vmem:[#allocation6 + $0xd0] sm:$0xff] }
  0xee   :  { %1487 = vmatpush.bf16.msrb.mxu0 %v2373_v6  ;;  %1527 = vmatpush.bf16.msrb.mxu3 %v2399_v51 }
  0xf0   :  { %1501 = vmatpush.bf16.msrb.mxu1 %v2381_v11 }
  0xf1   :  { %1514 = vmatpush.bf16.msrb.mxu2 %v2390_v18  ;;  %v2393_v18 = vld [vmem:[#allocation6 + $0xc8] sm:$0xff] }
  0xf2   :  { %1488 = vmatpush.bf16.msrb.mxu0 %v2372_v7  ;;  %1528 = vmatpush.bf16.msrb.mxu3 %v2398_v57  ;;  %v343_v7 = vperm.slane %v2577_v20, 2 }
  0xf4   :  { %1502 = vmatpush.bf16.msrb.mxu1 %v2380_v19 }
  0xf5   :  { %1515 = vmatpush.bf16.msrb.mxu2 %v2389_v22 }
  0xf6   :  { %1489 = vmatpush.bf16.msrb.mxu0 %v2371_v8  ;;  %1529 = vmatpush.bf16.msrb.mxu3 %v2397_v61 }
  0xf8   :  { %1503 = vmatpush.bf16.msrb.mxu1 %v2379_v12 }
  0xf9   :  { %1516 = vmatpush.bf16.msrb.mxu2 %v2388_v26  ;;  %v2392_v26 = vld [vmem:[#allocation6 + $0xc0] sm:$0xff] }
  0xfa   :  { %1490 = vmatpush.bf16.msrb.mxu0 %v2370_v49  ;;  %1530 = vmatpush.bf16.msrb.mxu3 %v2396_v5 }
  0xfc   :  { %1504 = vmatpush.bf16.msrb.mxu1 %v2378_v17 }
  0xfd   :  { %1517 = vmatpush.bf16.msrb.mxu2 %v2387_v31 }
  0xfe   :  { %1491 = vmatpush.bf16.msrb.mxu0 %v2369_v54  ;;  %1531 = vmatpush.bf16.msrb.mxu3 %v2395_v10 }
 0x100   :  { %1505 = vmatpush.bf16.msrb.mxu1 %v2377_v21 }
 0x101   :  { %1518 = vmatpush.bf16.msrb.mxu2 %v2386_v36 }
 0x102   :  { %1492 = vmatpush.bf16.msrb.mxu0 %v2368_v13  ;;  %1532 = vmatpush.bf16.msrb.mxu3 %v2394_v14 }
 0x104   :  { %1506 = vmatpush.bf16.msrb.mxu1 %v2376_v25 }
 0x105   :  { %1519 = vmatpush.bf16.msrb.mxu2 %v2385_v43 }
 0x106   :  { %1533 = vmatpush.bf16.msrb.mxu3 %v2393_v18 }
 0x109   :  { %1520 = vmatpush.bf16.msrb.mxu2 %v2384_v50 }
 0x10a   :  { %1534 = vmatpush.bf16.msrb.mxu3 %v2392_v26 }
 0x121   :  { %v998_v15 = vpop.f32.mrf.mxu0 }
 0x122   :  { %v1012_v16 = vpop.f32.mrf.mxu1  ;;  %v999_v27 = vadd.f32 %v998_v15, %v341_v23 }
 0x124   :  { %v1013_v32 = vadd.f32 %v1012_v16, %v999_v27 }
 0x129   :  { %v1000_v24 = vpop.f32.mrf.mxu0 }
 0x12a   :  { %v1014_v28 = vpop.f32.mrf.mxu1  ;;  %v1001_v33 = vadd.f32 %v1000_v24, %v341_v23 }
 0x12c   :  { %v1015_v37 = vadd.f32 %v1014_v28, %v1001_v33  ;;  %v344_v33 = vperm.slane %v2577_v20, 3 }
 0x12f   :  { %v1026_v29 = vpop.f32.mrf.mxu2 }
 0x130   :  { %v1040_v30 = vpop.f32.mrf.mxu3  ;;  %v1027_v35 = vadd.f32 %v1026_v29, %v1013_v32 }
 0x131   :  { %v1054_v34 = vpop.f32.mrf.mxu0 }
 0x132   :  { %v1041_v39 = vadd.f32 %v1040_v30, %v1027_v35  ;;  %v1068_v40 = vpop.f32.mrf.mxu1  ;;  %v1055_v52 = vadd.f32 %v1054_v34, %v342_v44 }
 0x134   :  { %v1213_v47 = vmax.f32 %v1041_v39, 0.0  ;;  %v1069_v58 = vadd.f32 %v1068_v40, %v1055_v52 }
 0x137   :  { %v1028_v38 = vpop.f32.mrf.mxu2 }
 0x138   :  { %v1029_v41 = vadd.f32 %v1028_v38, %v1015_v37  ;;  %v1042_v42 = vpop.f32.mrf.mxu3 }
 0x139   :  { %v1056_v46 = vpop.f32.mrf.mxu0 }
 0x13a   :  { %v1043_v45 = vadd.f32 %v1042_v42, %v1029_v41  ;;  %v1057_v59 = vadd.f32 %v1056_v46, %v342_v44  ;;  %v1070_v60 = vpop.f32.mrf.mxu1 }
 0x13c   :  { %v1217_v48 = vmax.f32 %v1043_v45, 0.0  ;;  %v1071_v0 = vadd.f32 %v1070_v60, %v1057_v59 }
 0x13e   :  { %v1221_v53 = vpack.c.bf16 %v1217_v48, %v1213_v47 }
 0x13f   :  { %v1082_v55 = vpop.f32.mrf.mxu2 }
 0x140   :  { %v1096_v56 = vpop.f32.mrf.mxu3  ;;  %1493 = vmatmul.bf16.vlgmr.msrb.gmra.mxu0 %v1221_v53  ;;  %v1083_v62 = vadd.f32 %v1082_v55, %v1069_v58  ;;  %v2407_v53 = vld [vmem:[%s2598_s6] ss:$0 sm:$0xff] }
 0x142   :  { %v1110_v63 = vpop.f32.mrf.mxu0  ;;  %v1097_v2 = vadd.f32 %v1096_v56, %v1083_v62 }
 0x143   :  { %v1111_v11 = vadd.f32 %v1110_v63, %v343_v7 }
 0x144   :  { %v1214_v8 = vmax.f32 %v1097_v2, 0.0 }
 0x145   :  { %v1124_v9 = vpop.f32.mrf.mxu1 }
 0x146   :  { %v1125_v15 = vadd.f32 %v1124_v9, %v1111_v11 }
 0x147   :  { %v1084_v1 = vpop.f32.mrf.mxu2 }
 0x148   :  { %v1085_v3 = vadd.f32 %v1084_v1, %v1071_v0  ;;  %v1098_v4 = vpop.f32.mrf.mxu3 }
 0x14a   :  { %v1099_v6 = vadd.f32 %v1098_v4, %v1085_v3  ;;  %v1112_v13 = vpop.f32.mrf.mxu0 }
 0x14b   :  { %v1113_v16 = vadd.f32 %v1112_v13, %v343_v7 }
 0x14c   :  { %v1218_v49 = vmax.f32 %v1099_v6, 0.0 }
 0x14d   :  { %v1126_v21 = vpop.f32.mrf.mxu1 }
 0x14e   :  { %v1222_v54 = vpack.c.bf16 %v1218_v49, %v1214_v8  ;;  %v1127_v22 = vadd.f32 %v1126_v21, %v1113_v16 }
 0x14f   :  { %v1138_v19 = vpop.f32.mrf.mxu2 }
 0x150   :  { %v1152_v12 = vpop.f32.mrf.mxu3  ;;  %1507 = vmatmul.bf16.vlgmr.msrb.gmra.mxu1 %v1222_v54  ;;  %v1139_v17 = vadd.f32 %v1138_v19, %v1125_v15 }
 0x152   :  { %v1153_v24 = vadd.f32 %v1152_v12, %v1139_v17 }
 0x154   :  { %v1215_v29 = vmax.f32 %v1153_v24, 0.0 }
 0x157   :  { %v1140_v23 = vpop.f32.mrf.mxu2 }
 0x158   :  { %v1141_v25 = vadd.f32 %v1140_v23, %v1127_v22  ;;  %v1154_v27 = vpop.f32.mrf.mxu3 }
 0x15a   :  { %v1155_v28 = vadd.f32 %v1154_v27, %v1141_v25 }
 0x15c   :  { %v1219_v30 = vmax.f32 %v1155_v28, 0.0 }
 0x15e   :  { %v1223_v31 = vpack.c.bf16 %v1219_v30, %v1215_v29 }
 0x160   :  { %1521 = vmatmul.bf16.vlgmr.msrb.gmra.mxu2 %v1223_v31 }
 0x162   :  { %v1166_v32 = vpop.f32.mrf.mxu0 }
 0x163   :  { %v1167_v35 = vadd.f32 %v1166_v32, %v344_v33 }
 0x164   :  { %v1180_v34 = vpop.f32.mrf.mxu1 }
 0x165   :  { %v1181_v39 = vadd.f32 %v1180_v34, %v1167_v35 }
 0x16a   :  { %v1168_v36 = vpop.f32.mrf.mxu0 }
 0x16b   :  { %v1169_v40 = vadd.f32 %v1168_v36, %v344_v33 }
 0x16c   :  { %v1182_v42 = vpop.f32.mrf.mxu1 }
 0x16d   :  { %v1183_v43 = vadd.f32 %v1182_v42, %v1169_v40 }
 0x16f   :  { %v1194_v37 = vpop.f32.mrf.mxu2 }
 0x170   :  { %v1208_v38 = vpop.f32.mrf.mxu3  ;;  %v1195_v41 = vadd.f32 %v1194_v37, %v1181_v39 }
 0x172   :  { %v1209_v45 = vadd.f32 %v1208_v38, %v1195_v41 }
 0x174   :  { %v1216_v50 = vmax.f32 %v1209_v45, 0.0 }
 0x177   :  { %v1196_v44 = vpop.f32.mrf.mxu2 }
 0x178   :  { %v1197_v46 = vadd.f32 %v1196_v44, %v1183_v43  ;;  %v1210_v47 = vpop.f32.mrf.mxu3 }
 0x17a   :  { %v1211_v48 = vadd.f32 %v1210_v47, %v1197_v46 }
 0x17c   :  { %v1220_v51 = vmax.f32 %v1211_v48, 0.0 }
 0x17e   :  { %v1224_v52 = vpack.c.bf16 %v1220_v51, %v1216_v50 }
 0x180   :  { %1535 = vmatmul.bf16.vlgmr.msrb.gmra.mxu3 %v1224_v52 }
 0x1bd   :  { %v1494_v20 = vpop.f32.mrf.mxu0 }
 0x1be   :  { %v1495_v57 = vadd.f32 %v2407_v53, %v1494_v20 }
 0x1c5   :  { %v1496_v60 = vpop.f32.mrf.mxu0 }
 0x1c6   :  { %v1497_v0 = vadd.f32 %v2407_v53, %v1496_v60 }
 0x1cd   :  { %v1508_v55 = vpop.f32.mrf.mxu1 }
 0x1ce   :  { %v1509_v58 = vadd.f32 %v1508_v55, %v1495_v57 }
 0x1d5   :  { %v1510_v63 = vpop.f32.mrf.mxu1 }
 0x1d6   :  { %v1511_v3 = vadd.f32 %v1510_v63, %v1497_v0 }
 0x1e3   :  { %v1522_v56 = vpop.f32.mrf.mxu2 }
 0x1e4   :  { %v1523_v59 = vadd.f32 %v1522_v56, %v1509_v58 }
 0x1eb   :  { %v1524_v2 = vpop.f32.mrf.mxu2 }
 0x1ec   :  { %v1525_v4 = vadd.f32 %v1524_v2, %v1511_v3 }
 0x203   :  { %v1536_v61 = vpop.f32.mrf.mxu3 }
 0x204   :  { %v1537_v62 = vadd.f32 %v1536_v61, %v1523_v59 }
 0x206   :  { %v1541_v1 = vmax.f32 %v1537_v62, 0.0 }
 0x208   :  { %1543 = vst [vmem:[%s2599_s7] sm:$0xff] %v1541_v1 }
 0x20b   :  { %v1538_v5 = vpop.f32.mrf.mxu3 }
 0x20c   :  { %v1539_v6 = vadd.f32 %v1538_v5, %v1525_v4 }
 0x20e   :  { %v1542_v7 = vmax.f32 %v1539_v6, 0.0 }
 0x210   :  { %1544 = vst [vmem:[%s2599_s7 + $0x8] sm:$0xff] %v1542_v7 }
 0x211   :  { %1549 = vsyncpa [#allocation3], 1 }
 0x212   :  { %1550 = vsyncpa [#allocation5], 1 }

</bundles_post_ra>
